<compile_context>
chip_gen: v6e
topology: v6e:2x2x1
jax: 0.10.0
libtpu: 0.0.40
codegen_flags: <defaults>
</compile_context>

<pallas_src>
import functools
import math

import jax
import jax.numpy as jnp
from jax.experimental import pallas as pl
from jax.experimental.pallas import tpu as pltpu


# -----------------------------------------------------------------------------
# Kernel 1: embedding row gather (DMA from HBM table, ids in SMEM) + fused QKV.
# grid = (batch, seq_tiles), both "parallel".
# -----------------------------------------------------------------------------
def embed_qkv_kernel(ids_ref,              # SMEM (B, S) int32        [scalar prefetch]
                     emb_hbm,              # HBM  (V, D) f32          [memory_space=ANY]
                     wqkv_ref,             # VMEM (D, 3O) mxu dtype
                     bqkv_ref,             # VMEM (1, 3O) f32
                     x_ref,                # out  (ts, D) f32         (residual copy)
                     q_ref, k_ref, v_ref,  # out  (ts, O) mxu dtype
                     xbuf, sem,            # scratch: VMEM (ts, D) f32, DMA sems (ts,)
                     *, seq_tile, out_dim, scale):
    b = pl.program_id(0)
    si = pl.program_id(1)
    ts = seq_tile
    O = out_dim

    # Row gather: launch one small DMA per row (all overlapped), then wait.
    @pl.loop(0, ts)
    def _start_gather(r):
        tok = ids_ref[b, si * ts + r]
        pltpu.make_async_copy(emb_hbm.at[pl.ds(tok, 1)],
                              xbuf.at[pl.ds(r, 1)],
                              sem.at[r]).start()

    @pl.loop(0, ts)
    def _wait_gather(r):
        pltpu.make_async_copy(emb_hbm.at[pl.ds(0, 1)],
                              xbuf.at[pl.ds(r, 1)],
                              sem.at[r]).wait()

    x = xbuf[...]                                        # (ts, D) f32
    x_ref[...] = x                                       # f32 copy for the residual

    # Fused Q|K|V projection: one (ts, D) @ (D, 3O) MXU matmul, f32 accumulation.
    qkv = jnp.dot(x.astype(wqkv_ref.dtype), wqkv_ref[...],
                  preferred_element_type=jnp.float32) + bqkv_ref[...]
    q_ref[...] = (qkv[:, :O] * scale).astype(q_ref.dtype)   # fold 1/sqrt(hd) into q
    k_ref[...] = qkv[:, O:2 * O].astype(k_ref.dtype)
    v_ref[...] = qkv[:, 2 * O:].astype(v_ref.dtype)


# -----------------------------------------------------------------------------
# Kernel 2: flash-style self-attention + output projection + residual + LayerNorm.
# grid = (batch, q_tiles, heads, kv_tiles); (parallel, parallel, arbitrary, arbitrary).
# -----------------------------------------------------------------------------
def attn_residual_ln_kernel(x_ref,                  # (tq, D) f32  embedding (residual)
                            q_ref, k_ref, v_ref,    # (tq|tk, hd) mxu dtype
                            wo_ref,                 # (hd, D) mxu dtype  (this head's rows)
                            bo_ref, gamma_ref, beta_ref,   # (1, D) f32
                            out_ref,                # (tq, D) f32
                            m_sc, l_sc, acc_sc, proj_sc):
    h = pl.program_id(2)
    ki = pl.program_id(3)
    last_h = pl.num_programs(2) - 1
    last_k = pl.num_programs(3) - 1

    @pl.when((h == 0) & (ki == 0))
    def _init_proj():
        proj_sc[...] = jnp.zeros(proj_sc.shape, proj_sc.dtype)

    @pl.when(ki == 0)
    def _init_head():
        m_sc[...] = jnp.full(m_sc.shape, -jnp.inf, m_sc.dtype)
        l_sc[...] = jnp.zeros(l_sc.shape, l_sc.dtype)
        acc_sc[...] = jnp.zeros(acc_sc.shape, acc_sc.dtype)

    q = q_ref[...]                                           # (tq, hd), pre-scaled
    k = k_ref[...]                                           # (tk, hd)
    v = v_ref[...]                                           # (tk, hd)

    # scores: q @ k^T on the MXU (no explicit transpose materialized), f32 acc.
    s = jax.lax.dot_general(q, k, (((1,), (1,)), ((), ())),
                            preferred_element_type=jnp.float32)      # (tq, tk)

    # online softmax update -- all elementwise math in f32 (VPU/EUP).
    m_prev = m_sc[...]
    m_new = jnp.maximum(m_prev, jnp.max(s, axis=-1, keepdims=True))
    alpha = jnp.exp(m_prev - m_new)
    p = jnp.exp(s - m_new)
    l_sc[...] = alpha * l_sc[...] + jnp.sum(p, axis=-1, keepdims=True)
    acc_sc[...] = alpha * acc_sc[...] + jnp.dot(p.astype(v.dtype), v,
                                                preferred_element_type=jnp.float32)
    m_sc[...] = m_new

    # End of the KV loop for this head: normalize and fold the head straight
    # into the output projection (contraction against wo[h]; no head re-concat).
    @pl.when(ki == last_k)
    def _finish_head():
        o = acc_sc[...] * pl.reciprocal(l_sc[...], approx=True)      # (tq, hd) f32
        proj_sc[...] += jnp.dot(o.astype(wo_ref.dtype), wo_ref[...],
                                preferred_element_type=jnp.float32)  # (tq, D)

    # End of the head loop: bias + residual + LayerNorm, one lane-dense store.
    @pl.when((h == last_h) & (ki == last_k))
    def _finish_block():
        res = x_ref[...] + proj_sc[...] + bo_ref[...]                # (tq, D) f32
        mean = jnp.mean(res, axis=-1, keepdims=True)
        cen = res - mean
        var = jnp.mean(cen * cen, axis=-1, keepdims=True)
        y = cen * jax.lax.rsqrt(var + 1e-5) * gamma_ref[...] + beta_ref[...]
        out_ref[...] = y.astype(out_ref.dtype)


# -----------------------------------------------------------------------------
# Wrapper: weight packing, two pallas_calls, head-major relayout in between.
# -----------------------------------------------------------------------------
def decoder_forward(token_ids, params, *, num_heads,
                    mxu_dtype=jnp.bfloat16,
                    seq_tile=None, q_tile=None, kv_tile=None,
                    vmem_limit_bytes=48 * 1024 * 1024):   # headroom under v7x's 64 MiB
    B, S = token_ids.shape
    emb = params["embedding"]
    V, D = emb.shape
    O = params["wq"].shape[1]
    H = num_heads
    assert O % H == 0
    hd = O // H

    # At real sizes use 128/256-multiples for seq/q/kv tiles; toy shapes use 8.
    ts = seq_tile or min(S, 128)
    tq = q_tile or min(S, 128)
    tk = kv_tile or min(S, 128)
    assert S % ts == 0 and S % tq == 0 and S % tk == 0
    itemsize = jnp.dtype(mxu_dtype).itemsize

    # Fuse Q|K|V weights once; cast MXU operands (bf16 on v6e/v7x), biases stay f32.
    wqkv = jnp.concatenate([params["wq"], params["wk"], params["wv"]],
                           axis=1).astype(mxu_dtype)                    # (D, 3O)
    bqkv = jnp.concatenate([params["bq"], params["bk"], params["bv"]], axis=1)  # (1, 3O)
    wo_h = params["wo"].reshape(H, hd, D).astype(mxu_dtype)             # per-head wo rows

    ids = token_ids.astype(jnp.int32)                                   # (B, S) -> SMEM

    # ---- kernel 1: embedding gather + fused QKV projection -------------------
    cost1 = pl.CostEstimate(
        flops=2 * B * S * D * 3 * O,
        transcendentals=0,
        bytes_accessed=(B * S * 4 + B * S * D * 4 + D * 3 * O * itemsize
                        + 3 * O * 4 + B * S * D * 4 + 3 * B * S * O * itemsize))
    x, q, k, v = pl.pallas_call(
        functools.partial(embed_qkv_kernel, seq_tile=ts, out_dim=O,
                          scale=1.0 / math.sqrt(hd)),
        out_shape=(
            jax.ShapeDtypeStruct((B, S, D), jnp.float32),
            jax.ShapeDtypeStruct((B, S, O), mxu_dtype),
            jax.ShapeDtypeStruct((B, S, O), mxu_dtype),
            jax.ShapeDtypeStruct((B, S, O), mxu_dtype),
        ),
        grid_spec=pltpu.PrefetchScalarGridSpec(
            num_scalar_prefetch=1,                         # token ids live in SMEM
            grid=(B, S // ts),
            in_specs=[
                pl.BlockSpec(memory_space=pl.ANY),         # embedding table stays in HBM
                pl.BlockSpec((D, 3 * O), lambda b, si, ids: (0, 0)),   # wqkv (invariant)
                pl.BlockSpec((1, 3 * O), lambda b, si, ids: (0, 0)),   # bqkv (invariant)
            ],
            out_specs=[
                pl.BlockSpec((None, ts, D), lambda b, si, ids: (b, si, 0)),
                pl.BlockSpec((None, ts, O), lambda b, si, ids: (b, si, 0)),
                pl.BlockSpec((None, ts, O), lambda b, si, ids: (b, si, 0)),
                pl.BlockSpec((None, ts, O), lambda b, si, ids: (b, si, 0)),
            ],
            scratch_shapes=[pltpu.VMEM((ts, D), jnp.float32),
                            pltpu.SemaphoreType.DMA((ts,))],
        ),
        compiler_params=pltpu.CompilerParams(
            dimension_semantics=("parallel", "parallel"),
            vmem_limit_bytes=vmem_limit_bytes),
        cost_estimate=cost1,
    )(ids, emb, wqkv, bqkv)

    # Head-major Q/K/V for the flash kernel.  Layout plumbing done once by XLA,
    # outside the attention loop (no narrow per-head lane slices in the kernel).
    qh = q.reshape(B, S, H, hd).transpose(0, 2, 1, 3)
    kh = k.reshape(B, S, H, hd).transpose(0, 2, 1, 3)
    vh = v.reshape(B, S, H, hd).transpose(0, 2, 1, 3)

    # ---- kernel 2: flash attention + out-proj + residual + LayerNorm ---------
    cost2 = pl.CostEstimate(
        flops=4 * B * H * S * S * hd + 2 * B * S * O * D,
        transcendentals=B * H * S * S,
        bytes_accessed=(2 * B * S * D * 4 + B * S * O * itemsize
                        + 2 * B * S * O * itemsize * (S // tq)
                        + H * hd * D * itemsize + 3 * D * 4))
    out = pl.pallas_call(
        attn_residual_ln_kernel,
        out_shape=jax.ShapeDtypeStruct((B, S, D), jnp.float32),
        grid_spec=pltpu.PrefetchScalarGridSpec(
            num_scalar_prefetch=0,
            grid=(B, S // tq, H, S // tk),
            in_specs=[
                pl.BlockSpec((None, tq, D), lambda b, qi, h, ki: (b, qi, 0)),        # x
                pl.BlockSpec((None, None, tq, hd), lambda b, qi, h, ki: (b, h, qi, 0)),  # q
                pl.BlockSpec((None, None, tk, hd), lambda b, qi, h, ki: (b, h, ki, 0)),  # k
                pl.BlockSpec((None, None, tk, hd), lambda b, qi, h, ki: (b, h, ki, 0)),  # v
                pl.BlockSpec((None, hd, D), lambda b, qi, h, ki: (h, 0, 0)),         # wo[h]
                pl.BlockSpec((1, D), lambda b, qi, h, ki: (0, 0)),                   # bo
                pl.BlockSpec((1, D), lambda b, qi, h, ki: (0, 0)),                   # gamma
                pl.BlockSpec((1, D), lambda b, qi, h, ki: (0, 0)),                   # beta
            ],
            out_specs=pl.BlockSpec((None, tq, D), lambda b, qi, h, ki: (b, qi, 0)),
            scratch_shapes=[pltpu.VMEM((tq, 1), jnp.float32),    # running max
                            pltpu.VMEM((tq, 1), jnp.float32),    # running denom
                            pltpu.VMEM((tq, hd), jnp.float32),   # per-head flash acc
                            pltpu.VMEM((tq, D), jnp.float32)],   # head-summed projection
        ),
        compiler_params=pltpu.CompilerParams(
            # batch / q-tile are independent -> split across v7x's two TensorCores;
            # head / kv-tile are reduction axes -> "arbitrary", kv innermost.
            dimension_semantics=("parallel", "parallel", "arbitrary", "arbitrary"),
            vmem_limit_bytes=vmem_limit_bytes),
        cost_estimate=cost2,
    )(x, qh, kh, vh, wo_h, params["bo"], params["gamma"], params["beta"])
    return out


# -----------------------------------------------------------------------------
# Pure-JAX reference (for correctness check)
# -----------------------------------------------------------------------------
def decoder_reference(token_ids, params, *, num_heads):
    x = jnp.take(params["embedding"], token_ids, axis=0)       # (B, S, D)
    q = x @ params["wq"] + params["bq"]
    k = x @ params["wk"] + params["bk"]
    v = x @ params["wv"] + params["bv"]
    B, S, O = q.shape
    hd = O // num_heads
    qh = q.reshape(B, S, num_heads, hd).transpose(0, 2, 1, 3)
    kh = k.reshape(B, S, num_heads, hd).transpose(0, 2, 1, 3)
    vh = v.reshape(B, S, num_heads, hd).transpose(0, 2, 1, 3)
    s = jnp.einsum("bhqd,bhkd->bhqk", qh, kh) / math.sqrt(hd)
    p = jax.nn.softmax(s, axis=-1)
    a = jnp.einsum("bhqk,bhkd->bhqd", p, vh).transpose(0, 2, 1, 3).reshape(B, S, O)
    proj = a @ params["wo"] + params["bo"]
    res = x + proj                                              # dropout(p=0) == identity
    mean = jnp.mean(res, axis=-1, keepdims=True)
    var = jnp.mean((res - mean) ** 2, axis=-1, keepdims=True)
    return (res - mean) / jnp.sqrt(var + 1e-5) * params["gamma"] + params["beta"]


# -----------------------------------------------------------------------------
# Deterministic parameter init (PyTorch-like)
# -----------------------------------------------------------------------------
def init_params(key, num_embedding, embedding_dim, output_dim):
    ks = jax.random.split(key, 9)
    u = lambda k, shape, fan_in: jax.random.uniform(
        k, shape, jnp.float32, -1.0 / math.sqrt(fan_in), 1.0 / math.sqrt(fan_in))
    D, O = embedding_dim, output_dim
    return {
        "embedding": jax.random.normal(ks[0], (num_embedding, D), jnp.float32),
        "wq": u(ks[1], (D, O), D), "bq": u(ks[2], (1, O), D),
        "wk": u(ks[3], (D, O), D), "bk": u(ks[4], (1, O), D),
        "wv": u(ks[5], (D, O), D), "bv": u(ks[6], (1, O), D),
        "wo": u(ks[7], (O, D), O), "bo": u(ks[8], (1, D), O),
        "gamma": jnp.ones((1, D), jnp.float32),
        "beta": jnp.zeros((1, D), jnp.float32),
    }


if __name__ == "__main__":
    num_embedding = 32     # vocab size
    embedding_dim = 32     # D
    output_dim = 32        # O (== D so the residual add is valid, as in the module)
    num_heads = 8
    batch, seq = 2, 16     # seq=16 with 8-wide tiles exercises the multi-tile flash loop

    key = jax.random.PRNGKey(0)
    pkey, tkey = jax.random.split(key)
    params = init_params(pkey, num_embedding, embedding_dim, output_dim)
    token_ids = jax.random.randint(tkey, (batch, seq), 0, num_embedding, jnp.int32)

    ref = decoder_reference(token_ids, params, num_heads=num_heads)

    # Production config: bf16 MXU operands (f32 accumulation / f32 VPU+EUP math).
    out_bf16 = decoder_forward(token_ids, params, num_heads=num_heads,
                               mxu_dtype=jnp.bfloat16,
                               seq_tile=8, q_tile=8, kv_tile=8)
    out_bf16 = jax.block_until_ready(out_bf16)
    assert out_bf16.shape == (batch, seq, embedding_dim)
    assert jnp.allclose(out_bf16, ref, atol=1e-1, rtol=1e-1), "bf16 kernel mismatch"

    # f32 MXU operands: tight numerical check of the algorithm itself.
    out_f32 = decoder_forward(token_ids, params, num_heads=num_heads,
                              mxu_dtype=jnp.float32,
                              seq_tile=8, q_tile=8, kv_tile=8)
    out_f32 = jax.block_until_ready(out_f32)
    assert jnp.allclose(out_f32, ref, atol=5e-3, rtol=5e-3), "f32 kernel mismatch"

    print("KERNEL_OK")
</pallas_src>

<mosaic_0001>
module attributes {stable_mosaic.version = 11 : i64} {
  func.func @embed_qkv_kernel(%arg0: i32, %arg1: i32, %arg2: memref<2x16xi32, #tpu.memory_space<smem>>, %arg3: memref<32x32xf32, #tpu.memory_space<any>>, %arg4: memref<32x96xbf16, #tpu.memory_space<vmem>>, %arg5: memref<1x96xf32, #tpu.memory_space<vmem>>, %arg6: memref<1x8x32xf32, #tpu.memory_space<vmem>>, %arg7: memref<1x8x32xbf16, #tpu.memory_space<vmem>>, %arg8: memref<1x8x32xbf16, #tpu.memory_space<vmem>>, %arg9: memref<1x8x32xbf16, #tpu.memory_space<vmem>>, %arg10: memref<8x32xf32, #tpu.memory_space<vmem>>, %arg11: memref<8x!tpu.dma_semaphore, #tpu.memory_space<semaphore_mem>>) attributes {dimension_semantics = [#tpu.dimension_semantics<parallel>, #tpu.dimension_semantics<parallel>], iteration_bounds = array<i64: 2, 2>, scalar_prefetch = 1 : i64, scratch_operands = 2 : i64, tpu.core_type = #tpu.core_type<tc>, window_params = [{}, {pipeline_mode = #tpu.pipeline_mode<synchronous>, transform_indices = @transform_1, window_bounds = array<i64: 32, 96>}, {pipeline_mode = #tpu.pipeline_mode<synchronous>, transform_indices = @transform_2, window_bounds = array<i64: 1, 96>}, {transform_indices = @transform_3, window_bounds = array<i64: 1, 8, 32>}, {transform_indices = @transform_4, window_bounds = array<i64: 1, 8, 32>}, {transform_indices = @transform_5, window_bounds = array<i64: 1, 8, 32>}, {transform_indices = @transform_6, window_bounds = array<i64: 1, 8, 32>}]} {
    %c0_i32 = arith.constant 0 : i32
    %c8_i32 = arith.constant 8 : i32
    %0 = arith.addi %c0_i32, %c8_i32 : i32
    %c1_i32 = arith.constant 1 : i32
    scf.for %arg12 = %c0_i32 to %0 step %c1_i32  : i32 {
      %c1_i32_23 = arith.constant 1 : i32
      %29 = arith.muli %arg12, %c1_i32_23 : i32
      %c0_i32_24 = arith.constant 0 : i32
      %30 = arith.addi %c0_i32_24, %29 : i32
      %c8_i32_25 = arith.constant 8 : i32
      %31 = arith.muli %arg1, %c8_i32_25 : i32
      %32 = arith.addi %31, %30 : i32
      %33 = arith.index_cast %arg0 : i32 to index
      %34 = arith.index_cast %32 : i32 to index
      %35 = memref.load %arg2[%33, %34] : memref<2x16xi32, #tpu.memory_space<smem>>
      %c0_i32_26 = arith.constant 0 : i32
      %36 = tpu.memref_slice %arg3[%35, %c0_i32_26] : memref<32x32xf32, #tpu.memory_space<any>> -> memref<1x32xf32, #tpu.memory_space<any>>
      %c0_i32_27 = arith.constant 0 : i32
      %37 = tpu.memref_slice %arg10[%30, %c0_i32_27] : memref<8x32xf32, #tpu.memory_space<vmem>> -> memref<1x32xf32, #tpu.memory_space<vmem>>
      %38 = tpu.memref_slice %arg11[%30] : memref<8x!tpu.dma_semaphore, #tpu.memory_space<semaphore_mem>> -> memref<1x!tpu.dma_semaphore, #tpu.memory_space<semaphore_mem>>
      %39 = tpu.memref_squeeze %38 : memref<1x!tpu.dma_semaphore, #tpu.memory_space<semaphore_mem>> -> memref<!tpu.dma_semaphore, #tpu.memory_space<semaphore_mem>>
      tpu.enqueue_dma source(%36 : memref<1x32xf32, #tpu.memory_space<any>>) target(%37 : memref<1x32xf32, #tpu.memory_space<vmem>>) target_semaphore(%39 : memref<!tpu.dma_semaphore, #tpu.memory_space<semaphore_mem>>)
    }
    %c8_i32_0 = arith.constant 8 : i32
    %c0_i32_1 = arith.constant 0 : i32
    %c8_i32_2 = arith.constant 8 : i32
    %1 = arith.addi %c0_i32_1, %c8_i32_2 : i32
    %c1_i32_3 = arith.constant 1 : i32
    scf.for %arg12 = %c0_i32_1 to %1 step %c1_i32_3  : i32 {
      %c1_i32_23 = arith.constant 1 : i32
      %29 = arith.muli %arg12, %c1_i32_23 : i32
      %c0_i32_24 = arith.constant 0 : i32
      %30 = arith.addi %c0_i32_24, %29 : i32
      %c0_i32_25 = arith.constant 0 : i32
      %c0_i32_26 = arith.constant 0 : i32
      %31 = tpu.memref_slice %arg3[%c0_i32_25, %c0_i32_26] : memref<32x32xf32, #tpu.memory_space<any>> -> memref<1x32xf32, #tpu.memory_space<any>>
      %c0_i32_27 = arith.constant 0 : i32
      %32 = tpu.memref_slice %arg10[%30, %c0_i32_27] : memref<8x32xf32, #tpu.memory_space<vmem>> -> memref<1x32xf32, #tpu.memory_space<vmem>>
      %33 = tpu.memref_slice %arg11[%30] : memref<8x!tpu.dma_semaphore, #tpu.memory_space<semaphore_mem>> -> memref<1x!tpu.dma_semaphore, #tpu.memory_space<semaphore_mem>>
      %34 = tpu.memref_squeeze %33 : memref<1x!tpu.dma_semaphore, #tpu.memory_space<semaphore_mem>> -> memref<!tpu.dma_semaphore, #tpu.memory_space<semaphore_mem>>
      tpu.wait_dma2 semaphore(%34 : memref<!tpu.dma_semaphore, #tpu.memory_space<semaphore_mem>>) src(%31 : memref<1x32xf32, #tpu.memory_space<any>>) dst(%32 : memref<1x32xf32, #tpu.memory_space<vmem>>)
    }
    %c8_i32_4 = arith.constant 8 : i32
    %c0 = arith.constant 0 : index
    %c0_5 = arith.constant 0 : index
    %2 = vector.load %arg10[%c0, %c0_5] : memref<8x32xf32, #tpu.memory_space<vmem>>, vector<8x32xf32>
    %c0_6 = arith.constant 0 : index
    %c0_7 = arith.constant 0 : index
    %c0_8 = arith.constant 0 : index
    %3 = vector.load %arg6[%c0_6, %c0_7, %c0_8] : memref<1x8x32xf32, #tpu.memory_space<vmem>>, vector<1x8x32xf32>
    %4 = vector.shape_cast %3 : vector<1x8x32xf32> to vector<8x32xf32>
    %5 = vector.shape_cast %2 : vector<8x32xf32> to vector<1x8x32xf32>
    tpu.vector_store %arg6[%c0_6, %c0_7, %c0_8], %5 {strides = array<i32>} : memref<1x8x32xf32, #tpu.memory_space<vmem>>, vector<1x8x32xf32>,
    %6 = arith.truncf %2 : vector<8x32xf32> to vector<8x32xbf16>
    %c0_9 = arith.constant 0 : index
    %c0_10 = arith.constant 0 : index
    %7 = vector.load %arg4[%c0_9, %c0_10] : memref<32x96xbf16, #tpu.memory_space<vmem>>, vector<32x96xbf16>
    %cst = arith.constant dense<0.000000e+00> : vector<8x96xf32>
    %8 = tpu.matmul %6, %7, %cst {dimension_numbers = #tpu.dot_dimension_numbers<[1], [0], [0], [1], [0, 0, 1, 1], [], []>} : vector<8x32xbf16>, vector<32x96xbf16>, vector<8x96xf32> -> vector<8x96xf32>
    %c0_11 = arith.constant 0 : index
    %c0_12 = arith.constant 0 : index
    %9 = vector.load %arg5[%c0_11, %c0_12] : memref<1x96xf32, #tpu.memory_space<vmem>>, vector<1x96xf32>
    %10 = vector.broadcast %9 : vector<1x96xf32> to vector<8x96xf32>
    %11 = arith.addf %8, %10 : vector<8x96xf32>
    %12 = vector.extract_strided_slice %11 {offsets = [0, 0], sizes = [8, 32], strides = [1, 1]} : vector<8x96xf32> to vector<8x32xf32>
    %cst_13 = arith.constant 5.000000e-01 : f32
    %13 = vector.broadcast %cst_13 : f32 to vector<8x32xf32>
    %14 = arith.mulf %12, %13 : vector<8x32xf32>
    %15 = arith.truncf %14 : vector<8x32xf32> to vector<8x32xbf16>
    %c0_14 = arith.constant 0 : index
    %c0_15 = arith.constant 0 : index
    %c0_16 = arith.constant 0 : index
    %16 = vector.load %arg7[%c0_14, %c0_15, %c0_16] : memref<1x8x32xbf16, #tpu.memory_space<vmem>>, vector<1x8x32xbf16>
    %17 = vector.shape_cast %16 : vector<1x8x32xbf16> to vector<8x32xbf16>
    %18 = vector.shape_cast %15 : vector<8x32xbf16> to vector<1x8x32xbf16>
    tpu.vector_store %arg7[%c0_14, %c0_15, %c0_16], %18 {strides = array<i32>} : memref<1x8x32xbf16, #tpu.memory_space<vmem>>, vector<1x8x32xbf16>,
    %19 = vector.extract_strided_slice %11 {offsets = [0, 32], sizes = [8, 32], strides = [1, 1]} : vector<8x96xf32> to vector<8x32xf32>
    %20 = arith.truncf %19 : vector<8x32xf32> to vector<8x32xbf16>
    %c0_17 = arith.constant 0 : index
    %c0_18 = arith.constant 0 : index
    %c0_19 = arith.constant 0 : index
    %21 = vector.load %arg8[%c0_17, %c0_18, %c0_19] : memref<1x8x32xbf16, #tpu.memory_space<vmem>>, vector<1x8x32xbf16>
    %22 = vector.shape_cast %21 : vector<1x8x32xbf16> to vector<8x32xbf16>
    %23 = vector.shape_cast %20 : vector<8x32xbf16> to vector<1x8x32xbf16>
    tpu.vector_store %arg8[%c0_17, %c0_18, %c0_19], %23 {strides = array<i32>} : memref<1x8x32xbf16, #tpu.memory_space<vmem>>, vector<1x8x32xbf16>,
    %24 = vector.extract_strided_slice %11 {offsets = [0, 64], sizes = [8, 32], strides = [1, 1]} : vector<8x96xf32> to vector<8x32xf32>
    %25 = arith.truncf %24 : vector<8x32xf32> to vector<8x32xbf16>
    %c0_20 = arith.constant 0 : index
    %c0_21 = arith.constant 0 : index
    %c0_22 = arith.constant 0 : index
    %26 = vector.load %arg9[%c0_20, %c0_21, %c0_22] : memref<1x8x32xbf16, #tpu.memory_space<vmem>>, vector<1x8x32xbf16>
    %27 = vector.shape_cast %26 : vector<1x8x32xbf16> to vector<8x32xbf16>
    %28 = vector.shape_cast %25 : vector<8x32xbf16> to vector<1x8x32xbf16>
    tpu.vector_store %arg9[%c0_20, %c0_21, %c0_22], %28 {strides = array<i32>} : memref<1x8x32xbf16, #tpu.memory_space<vmem>>, vector<1x8x32xbf16>,
    return
  }
  func.func @transform_1(%arg0: i32, %arg1: i32, %arg2: memref<2x16xi32, #tpu.memory_space<smem>>) -> (i32, i32) {
    %c0_i32 = arith.constant 0 : i32
    %c0_i32_0 = arith.constant 0 : i32
    %c0_i32_1 = arith.constant 0 : i32
    return %c0_i32, %c0_i32_0 : i32, i32
  }
  func.func @transform_2(%arg0: i32, %arg1: i32, %arg2: memref<2x16xi32, #tpu.memory_space<smem>>) -> (i32, i32) {
    %c0_i32 = arith.constant 0 : i32
    %c0_i32_0 = arith.constant 0 : i32
    %c0_i32_1 = arith.constant 0 : i32
    return %c0_i32, %c0_i32_0 : i32, i32
  }
  func.func @transform_3(%arg0: i32, %arg1: i32, %arg2: memref<2x16xi32, #tpu.memory_space<smem>>) -> (i32, i32, i32) {
    %c0_i32 = arith.constant 0 : i32
    %c0_i32_0 = arith.constant 0 : i32
    return %arg0, %arg1, %c0_i32 : i32, i32, i32
  }
  func.func @transform_4(%arg0: i32, %arg1: i32, %arg2: memref<2x16xi32, #tpu.memory_space<smem>>) -> (i32, i32, i32) {
    %c0_i32 = arith.constant 0 : i32
    %c0_i32_0 = arith.constant 0 : i32
    return %arg0, %arg1, %c0_i32 : i32, i32, i32
  }
  func.func @transform_5(%arg0: i32, %arg1: i32, %arg2: memref<2x16xi32, #tpu.memory_space<smem>>) -> (i32, i32, i32) {
    %c0_i32 = arith.constant 0 : i32
    %c0_i32_0 = arith.constant 0 : i32
    return %arg0, %arg1, %c0_i32 : i32, i32, i32
  }
  func.func @transform_6(%arg0: i32, %arg1: i32, %arg2: memref<2x16xi32, #tpu.memory_space<smem>>) -> (i32, i32, i32) {
    %c0_i32 = arith.constant 0 : i32
    %c0_i32_0 = arith.constant 0 : i32
    return %arg0, %arg1, %c0_i32 : i32, i32, i32
  }
}

</mosaic_0001>

<bundles_post_ra>
// kernel: tpu_custom_call.1
= control target key start
LH: loop header
LB: loop body
LE: loop exit
PB: predicated region body
PF: predicated region fallthrough
CT: control target
= control target key end

     0   :  { %s1151_s24 = smov [#allocation5]   ;;  %s1495_s0 = inlined_call_operand.hbm [shape: s32[2,16], index: 0, kind: input, shape index: {}]   ;;  %s1496_s1 = inlined_call_operand.hbm [shape: f32[32,32], index: 1, kind: input, shape index: {}]   ;;  %s1497_s2 = inlined_call_operand.hbm [shape: bf16[32,96], index: 2, kind: input, shape index: {}]   ;;  %s1498_s3 = inlined_call_operand.vmem [shape: f32[1,96], index: 3, kind: input, shape index: {}]   ;;  %s1499_s4 = inlined_call_operand.hbm [shape: f32[2,16,32], index: 4, kind: output, shape index: {0}]   ;;  %s1500_s5 = inlined_call_operand.hbm [shape: bf16[2,16,32], index: 5, kind: output, shape index: {1}]   ;;  %s1501_s6 = inlined_call_operand.hbm [shape: bf16[2,16,32], index: 6, kind: output, shape index: {2}]   ;;  %s1502_s7 = inlined_call_operand.hbm [shape: bf16[2,16,32], index: 7, kind: output, shape index: {3}]  }
   0x1   :  { %1515 = sst [smem:[#allocation35_spill]] %s1497_s2 }
   0x2   :  { %1516 = sst [smem:[#allocation36_spill]] %s1502_s7 }
   0x3   :  { %14 = dma.hbm_to_smem %s1495_s0, 32, %s1151_s24, [#allocation4] }
   0x4   :  { %1091 = dma.done.wait [#allocation4], 32 }
   0x5   :  { %1092 = vsyncadd [#allocation4], 4294967264 }
   0x6   :  { %16 = sfence }
   0x7   :  { %17 = vsyncpa [#allocation7], 0 }
   0x8   :  { %18 = vsyncpa [#allocation8], 0 }
   0x9   :  { %20 = vsyncpa [#allocation8 + $0x1], 0 }
   0xa   :  { %21 = vsyncpa [#allocation11], 0 }
   0xb   :  { %23 = vsyncpa [#allocation11 + $0x1], 0 }
   0xc   :  { %24 = vsyncpa [#allocation14], 0 }
   0xd   :  { %26 = vsyncpa [#allocation14 + $0x1], 0  ;;  %s1207_s27 = smov 0   ;;  %s1209_s28 = smov 0  }
   0xe   :  { %s1211_s29 = smov 0   ;;  %s1213_s30 = smov 0  }
   0xf   :  { %s1215_s8 = smov 0   ;;  %s1217_s0 = smov 0  }
  0x10   :  { %s1219_s9 = smov 0   ;;  %s1221_s10 = smov 0  }
  0x11 LB: > { %1517 = sst [smem:[#allocation25_spill]] %s1113_s27  ;;  %s1248_s11 = sadd.s32 4294967295, %s1141_s10   ;;  %s1141_s10 = sphi %s1221_s10, %s32_s10   ;;  %s1137_s9 = sphi %s1219_s9, %s1549_s9   ;;  %s1133_s0 = sphi %s1217_s0, %s1548_s0   ;;  %s1129_s8 = sphi %s1215_s8, %s1547_s8   ;;  %s1125_s30 = sphi %s1213_s30, %s1546_s30   ;;  %s1121_s29 = sphi %s1211_s29, %s1545_s29   ;;  %s1117_s28 = sphi %s1209_s28, %s1544_s28   ;;  %s1113_s27 = sphi %s1207_s27, %s1543_s27  }
  0x12   : > { %1518 = sst [smem:[#allocation26_spill]] %s1117_s28  ;;  %s1503_s12 = sadd.s32 4294967294, %s1141_s10  }
  0x13   : > { %1519 = sst [smem:[#allocation27_spill]] %s1121_s29  ;;  %s41_s13 = sadd.s32 1, %s1133_s0 }
  0x14   : > { %1520 = sst [smem:[#allocation28_spill]] %s1133_s0  ;;  %s44_s14 = sadd.s32 1, %s1137_s9 }
  0x15   : > { %1521 = sst [smem:[#allocation29_spill]] %s1137_s9  ;;  %p42_p0 = scmp.ge.s32.totalorder %s41_s13, 2 }
  0x16   : > { %1522 = sst [smem:[#allocation30_spill]] %s1141_s10  ;;  %s95_s15 = sadd.s32 1, %s1121_s29 }
  0x17   : > { %p105_p1 = scmp.ne.s32.totalorder %s1121_s29, %s1117_s28  ;;  %p106_p2 = scmp.eq.s32.totalorder %s1248_s11, 3 }
  0x18   : > { %s1551_s13 = smov (%p42_p0, %s41_s13), 0  ;;  %s1553_s14 = smov (!%p42_p0, %s44_s14), %s1137_s9 }
  0x19   : > { %1523 = sst [smem:[#allocation31_spill]] %s1551_s13  ;;  %s91_s16 = ssub.s32 %s1133_s0, %s1551_s13 }
  0x1a   : > { %p1262_p3 = por %p106_p2, %p105_p1  ;;  %p46_p4 = scmp.ge.s32.totalorder %s1553_s14, 2 }
  0x1b   : > { %p111_p5 = scmp.ne.s32.totalorder %s1117_s28, %s1113_s27  ;;  %p112_p6 = scmp.eq.s32.totalorder %s1503_s12, 3 }
  0x1c   : > { %p719_p7 = scmp.ge.s32.totalorder %s1141_s10, 1  ;;  %s1555_s14 = smov (%p46_p4, %s1553_s14), 0 }
  0x1d   : > { %1525 = sst [smem:[#allocation32_spill]] %s1555_s14  ;;  %p1273_p8 = por %p112_p6, %p111_p5 }
  0x1e   : > { %p203_p9 = scmp.lt.s32.totalorder %s1141_s10, 5  ;;  %s90_s19 = ssub.s32 %s1137_s9, %s1555_s14 }
  0x1f   : > { %s1526_s18 = scalar_select %p1273_p8, 1, 0 }
  0x20   : > { %s92_s20 = sor.u32 %s91_s16, %s90_s19  ;;  %p1280_p10 = pnand %p719_p7, %p203_p9 }
  0x21   : > { %1527 = sst [smem:[#allocation33_spill]] %s1526_s18  ;;  %p93_p11 = scmp.eq.s32.totalorder %s92_s20, 0 }
  0x22   : > { %p798_p12 = scmp.eq.s32.totalorder %s1248_s11, 0  ;;  %p781_p13 = pneg %p1280_p10 }
  0x23   : > { %s1288_s22 = scalar_select %p93_p11, %s1121_s29, %s95_s15  }
  0x24   : > { %s1152_s23 = smov [#allocation6]   ;;  %p1292_p0 = pnand %p798_p12, %p781_p13 }
  0x25   : > { %1529 = sst [smem:[#allocation34_spill]] %s1288_s22  ;;  %s215_s24 = sshll.u32 %s1152_s23, 4  ;;  %s216_s24 = int_to_ptr.vmem [resolvable:$true] %s215_s24 }
  0x26   : > { %p901_p1 = pneg %p1292_p0  ;;  %s910_s26 = scalar_lea.vmem %s216_s24, 256 }
  0x27   : > { %p911_p2 = scmp.ne.s32.totalorder %s216_s24, %s910_s26  ;;  %p918_p6 = scmp.lt.s32.totalorder %s216_s24, %s216_s24 }
  0x28   : > { %p919_p7 = scmp.lt.s32.totalorder %s910_s26, %s910_s26 }
  0x29   : > { %p913_p4 = pnand %p911_p2, %p901_p1 }
  0x2a   : > { %p920_p9 = por %p919_p7, %p918_p6 }
  0x2b   : > { %p914_p5 = pneg %p913_p4 }
  0x2d   : > { %p921_p11 = pnand %p920_p9, %p914_p5 }
  0x2f   : > { %924 = shalt.err (!%p921_p11)
}
  0x30   : > { %s1153_s15 = smov 64   ;;  %s1154_s16 = smov 4  }
  0x31   : > { %s1531_s2 = sld [smem:[#allocation35_spill]] }
  0x33   : > { %234 = sbr.rel (%p1280_p10) target bundleno = 473 (0x1d9), region = 28 }
  0x37   : > { %784 = dma.hbm_to_vmem [thread:$0]  (!%p1292_p0), %s1531_s2, 256, %s216_s24, [#allocation7], %s1153_s15, %s1153_s15, %s1154_s16  }
  0x38   : > { %1094 = dma.done.wait (%p798_p12), [#allocation7], 256  }
  0x39   : > { %1096 = vsyncadd (%p798_p12), [#allocation7], 4294967040  ;;  %s1310_s23 = sand.u32 1, %s1117_s28   ;;  %s1321_s19 = smov 0  }
  0x3a   : > { %s723_s26 = sshll.u32 %s1310_s23, 3  ;;  %s1314_s25 = sshll.u32 %s1310_s23, 2 }
  0x3b   : > { %s1316_s24 = scalar_lea.vmem [#allocation9], %s723_s26 }
  0x3c LB: >> { %s727_s20 = sshll.u32 %s1125_s30, 3  ;;  %s291_s13 = scalar_lea.vmem [#allocation2], %s1145_s19  ;;  %s1145_s19 = sphi %s1321_s19, %s278_s19  }
  0x3d   : >> { %s280_s12 = sadd.s32 %s1145_s19, %s727_s20  ;;  %s300_s9 = sshll.u32 %s291_s13, 4  ;;  %s301_s9 = int_to_ptr.vmem [resolvable:$true] %s300_s9 }
  0x3e   : >> { %s281_s2 = sshra.s32 %s280_s12, 7  ;;  %s286_s26 = sand.u32 127, %s280_s12 }
  0x3f   : >> { %s283_s14 = sadd.s32 %s1129_s8, %s281_s2  ;;  %s292_s18 = scalar_lea.sflag [#allocation3], %s1145_s19 }
  0x40   : >> { %s728_s21 = sshll.u32 %s283_s14, 7  ;;  %s927_s20 = scalar_lea.hbm %s1496_s1, 512 }
  0x41   : >> { %s287_s15 = sadd.s32 %s728_s21, %s286_s26 }
  0x42   : >> { %s288_s16 = sld [smem:[#allocation5 + %s287_s15]] }
  0x48   : >> { %s729_s0 = sshll.u32 %s288_s16, 4 }
  0x49   : >> { %s290_s28 = scalar_lea.hbm %s1496_s1, %s729_s0 }
  0x4a   : >> { %s925_s27 = scalar_lea.hbm %s290_s28, 16  ;;  %p928_p12 = scmp.lt.s32.totalorder %s290_s28, %s1496_s1 }
  0x4b   : >> { %p926_p10 = scmp.ne.s32.totalorder %s290_s28, %s925_s27  ;;  %p929_p13 = scmp.lt.s32.totalorder %s927_s20, %s925_s27 }
  0x4d   : >> { %p930_p0 = por %p929_p13, %p928_p12 }
  0x4f   : >> { %p931_p1 = pnand %p930_p0, %p926_p10 }
  0x51   : >> { %934 = shalt.err (!%p931_p1)  }
  0x52   : >> { %s935_s13 = scalar_lea.vmem %s301_s9, 16  ;;  %s1155_s14 = smov [#allocation2]  }
  0x53   : >> { %p936_p2 = scmp.ne.s32.totalorder %s301_s9, %s935_s13  ;;  %s937_s29 = sshll.u32 %s1155_s14, 4  ;;  %s938_s29 = int_to_ptr.vmem [resolvable:$false] %s937_s29 }
  0x54   : >> { %s939_s0 = scalar_lea.vmem %s938_s29, 128  ;;  %p940_p4 = scmp.lt.s32.totalorder %s301_s9, %s938_s29 }
  0x55   : >> { %p941_p5 = scmp.lt.s32.totalorder %s939_s0, %s935_s13 }
  0x57   : >> { %p942_p6 = por %p941_p5, %p940_p4 }
  0x59   : >> { %p943_p7 = pnand %p942_p6, %p936_p2 }
  0x5b   : >> { %946 = shalt.err (!%p943_p7)  }
  0x5c   : >> { %303 = dma.hbm_to_vmem [thread:$0]  %s290_s28, 16, %s301_s9, %s292_s18 }
  0x5d   : >> { %s278_s19 = sadd.s32 1, %s1145_s19  }
  0x5e   : >> { %p275_p9 = scmp.ge.s32.totalorder %s278_s19, 8  }
  0x5f   : > { %s1147_s7 = smov (%p275_p9), 0  }
  0x60   : > { %277 = sbr.rel (!%p275_p9) target bundleno = 60 (0x3c), region = 143 }
  0x65 LB: >> { %s310_s27 = scalar_lea.sflag [#allocation3], %s1149_s7  ;;  %s1149_s7 = sphi %s1147_s7, %s309_s7  }
  0x66   : >> { %1097 = dma.done.wait %s310_s27, 16 }
  0x67   : >> { %1098 = vsyncadd %s310_s27, 4294967280  ;;  %s309_s7 = sadd.s32 1, %s1149_s7  }
  0x68   : >> { %p306_p11 = scmp.ge.s32.totalorder %s309_s7, 8  }
  0x69   : > { %v889_v0 = vld [vmem:[#allocation6 + $0x8] sm:$0xff] (%p306_p11)   ;;  %v1156_v1 = vmov (%p306_p11), 0.0   ;;  %v890_v2 = vld [vmem:[#allocation6] sm:$0xff] (%p306_p11)   ;;  %vm1157_vm0 = vmmov (%p306_p11), 0   ;;  %v314_v3 = vld [vmem:[#allocation2] sm:$0xff] (%p306_p11)  ;;  %vm315_vm1 = vcmask (%p306_p11), 261120  }
  0x6a   : > { %308 = sbr.rel (!%p306_p11) target bundleno = 101 (0x65), region = 154  ;;  %761 = vmatprep.subr.bf16.mxu0 (%p306_p11), %v1156_v1  ;;  %765 = vmatprep.mubr.msk.bf16.mxu0 (%p306_p11), %vm1157_vm0, %v1156_v1  ;;  %316 = vst.msk [vmem:[%s1316_s24] sm:$0xff] (%p306_p11), %vm315_vm1, %v314_v3  ;;  %v317_v4 = vpack.c.bf16 (%p306_p11), %v314_v3, %v314_v3  ;;  %s739_s28 = sshll.u32 (%p306_p11), %s1129_s8, 1  ;;  %v730_v5 = vld [vmem:[%s1498_s3] ss:$0 sm:$0xff] (%p306_p11) }
  0x6b   : > { %762 = vmatpush3.bf16.msra.mxu0 (%p306_p11), %v889_v0  ;;  %s1346_s9 = sadd.s32 (%p306_p11), %s1125_s30, %s739_s28  ;;  %s431_s19 = sshll.u32 (%p306_p11), %s1316_s24, 4  ;;  %s432_s19 = int_to_ptr.vmem [resolvable:$true] %s431_s19 }
  0x6c   : > { %763 = vmatprep.subr.bf16.mxu0 (%p306_p11), %v1156_v1  ;;  %s740_s10 = sshll.u32 (%p306_p11), %s1346_s9, 7  ;;  %s401_s26 = scalar_lea.sflag (%p306_p11), [#allocation8], %s1310_s23 }
  0x6d   : > { %s1355_s16 = scalar_lea.hbm (%p306_p11), %s1499_s4, %s740_s10  ;;  %s947_s20 = scalar_lea.vmem (%p306_p11), %s432_s19, 128 }
  0x6e   : > { %p948_p10 = scmp.ne.s32.totalorder (%p306_p11), %s432_s19, %s947_s20  ;;  %s1158_s30 = smov (%p306_p11), [#allocation9]  }
  0x6f   : > { %764 = vmatpush3.bf16.msra.mxu0 %v890_v2  ;;  %s951_s8 = sshll.u32 %s1158_s30, 4  ;;  %s952_s8 = int_to_ptr.vmem [resolvable:$false] %s951_s8 }
  0x70   : > { %p949_p12 = pnand %p948_p10, %p1262_p3  ;;  %s953_s12 = scalar_lea.vmem %s952_s8, 256 }
  0x71   : > { %p954_p0 = scmp.lt.s32.totalorder %s432_s19, %s952_s8  ;;  %p955_p1 = scmp.lt.s32.totalorder %s953_s12, %s947_s20 }
  0x72   : > { %766 = vmatmul.mubr.msk.bf16.vlgmr.msra.gmra.mxu0 %vm315_vm1, %v317_v4  ;;  %p950_p13 = pneg %p949_p12 }
  0x73   : > { %p956_p2 = por %p955_p1, %p954_p0 }
  0x75   : > { %p957_p4 = pnand %p956_p2, %p950_p13 }
 0x132   : > { %v378_v6 = vpop.f32.mrf.mxu0 }
 0x133   : > { %960 = shalt.err (!%p957_p4)
}
 0x134   : > { %s961_s24 = scalar_lea.hbm %s1355_s16, 128  ;;  %s965_s14 = scalar_lea.hbm %s1499_s4, 512 }
 0x135   : > { %p962_p5 = scmp.ne.s32.totalorder %s1355_s16, %s961_s24  ;;  %p966_p9 = scmp.lt.s32.totalorder %s1355_s16, %s1499_s4 }
 0x136   : > { %p967_p11 = scmp.lt.s32.totalorder %s965_s14, %s961_s24 }
 0x137   : > { %p963_p6 = pnand %p962_p5, %p1262_p3 }
 0x138   : > { %p968_p10 = por %p967_p11, %p966_p9 }
 0x139   : > { %p964_p7 = pneg %p963_p6 }
 0x13b   : > { %p969_p12 = pnand %p968_p10, %p964_p7 }
 0x13d   : > { %972 = shalt.err (!%p969_p12)
}
 0x13e   : > { %773 = dma.vmem_to_hbm [thread:$0]  (%p1262_p3), %s432_s19, 128, %s1355_s16, %s401_s26   ;;  %v379_v7 = vadd.f32 %v730_v5, %v378_v6  ;;  %v767_v8 = vpop.f32.mrf.mxu0  ;;  %vm386_vm2 = vcmask 257024  }
 0x13f   : > { %s405_s7 = sand.u32 1, %s1248_s11   ;;  %s1377_s27 = sshll.u32 %s1346_s9, 6 }
 0x140   : > { %s1532_s28 = scalar_lea.vmem [#allocation10], %s1314_s25  ;;  %v384_v9 = vmul.f32 0.5, %v379_v7  ;;  %v757_v10 = vpack.c.bf16 %v379_v7, %v379_v7  ;;  %v381_v11 = vpop.f32.mrf.mxu0  ;;  %s1159_s18 = smov 96  }
 0x141   : > { %s446_s10 = sshll.u32 %s1532_s28, 4  ;;  %s1385_s15 = scalar_lea.hbm %s1500_s5, %s1377_s27  ;;  %s447_s10 = int_to_ptr.vmem [resolvable:$true] %s446_s10 }
 0x142   : > { %v385_v12 = vpack.c.bf16 %v384_v9, %v384_v9  ;;  %392 = vrot.lane.b32.xlu0 %v757_v10, %s1159_s18  ;;  %v768_v13 = vpop.f32.mrf.mxu0  ;;  %s1533_s11 = smov %s1532_s28  ;;  %s1390_s9 = scalar_lea.sflag [#allocation11], %s405_s7 }
 0x143   : > { %s973_s16 = scalar_lea.vmem %s447_s10, 64  ;;  %s1160_s19 = smov [#allocation10]  }
 0x144   : > { %387 = vst.msk [vmem:[%s1533_s11] sm:$0xf] %vm386_vm2, %v385_v12  ;;  %p974_p13 = scmp.ne.s32.totalorder %s447_s10, %s973_s16  ;;  %s977_s26 = sshll.u32 %s1160_s19, 4  ;;  %s978_s26 = int_to_ptr.vmem [resolvable:$false] %s977_s26 }
 0x145   : > { %s979_s20 = scalar_lea.vmem %s978_s26, 128  ;;  %p980_p2 = scmp.lt.s32.totalorder %s447_s10, %s978_s26 }
 0x146   : > { %p975_p0 = pnand %p974_p13, %p1262_p3  ;;  %p981_p4 = scmp.lt.s32.totalorder %s979_s20, %s973_s16 }
 0x148   : > { %p976_p1 = pneg %p975_p0  ;;  %p982_p5 = por %p981_p4, %p980_p2 }
 0x14a   : > { %p983_p6 = pnand %p982_p5, %p976_p1 }
 0x14c   : > { %986 = shalt.err (!%p983_p6)
}
 0x14d   : > { %s987_s30 = scalar_lea.hbm %s1385_s15, 64  ;;  %s991_s24 = scalar_lea.hbm %s1500_s5, 256 }
 0x14e   : > { %p988_p7 = scmp.ne.s32.totalorder %s1385_s15, %s987_s30  ;;  %p992_p10 = scmp.lt.s32.totalorder %s1385_s15, %s1500_s5 }
 0x14f   : > { %p993_p12 = scmp.lt.s32.totalorder %s991_s24, %s987_s30 }
 0x150   : > { %p989_p9 = pnand %p988_p7, %p1262_p3 }
 0x151   : > { %p994_p13 = por %p993_p12, %p992_p10 }
 0x152   : > { %p990_p11 = pneg %p989_p9 }
 0x154   : > { %p995_p0 = pnand %p994_p13, %p990_p11 }
 0x156   : > { %998 = shalt.err (!%p995_p0)
}
 0x157   : > { %774 = dma.vmem_to_hbm [thread:$0]  (%p1262_p3), %s447_s10, 64, %s1385_s15, %s1390_s9  }
 0x158   : > { %s1161_s14 = smov 64   ;;  %s1534_s29 = scalar_lea.vmem [#allocation12], %s1314_s25 }
 0x159   : > { %396 = vrot.lane.b32.xlu0 %v757_v10, %s1161_s14  ;;  %s461_s0 = sshll.u32 %s1534_s29, 4  ;;  %s1415_s18 = scalar_lea.hbm %s1501_s6, %s1377_s27  ;;  %s462_s0 = int_to_ptr.vmem [resolvable:$true] %s461_s0 }
 0x15a   : > { %s1535_s22 = scalar_lea.vmem [#allocation13], %s1314_s25  ;;  %s1536_s11 = smov %s1534_s29 }
 0x15b   : > { %s476_s21 = sshll.u32 %s1535_s22, 4  ;;  %s999_s16 = scalar_lea.vmem %s462_s0, 64  ;;  %s477_s21 = int_to_ptr.vmem [resolvable:$true] %s476_s21 }
 0x15c   : > { %p1000_p1 = scmp.ne.s32.totalorder %s462_s0, %s999_s16  ;;  %s1162_s10 = smov [#allocation12]  }
 0x15d   : > { %s1003_s15 = sshll.u32 %s1162_s10, 4  ;;  %s1004_s15 = int_to_ptr.vmem [resolvable:$false] %s1003_s15 }
 0x15e   : > { %p1001_p2 = pnand %p1000_p1, %p1262_p3  ;;  %s1005_s19 = scalar_lea.vmem %s1004_s15, 128 }
 0x15f   : > { %p1006_p5 = scmp.lt.s32.totalorder %s462_s0, %s1004_s15  ;;  %p1007_p6 = scmp.lt.s32.totalorder %s1005_s19, %s999_s16 }
 0x160   : > { %p1002_p4 = pneg %p1001_p2 }
 0x161   : > { %p1008_p7 = por %p1007_p6, %p1006_p5 }
 0x163   : > { %p1009_p9 = pnand %p1008_p7, %p1002_p4 }
 0x1b4   : > { %v393_v14 = vpop.permute.xlu0 %392 }
 0x1b5   : > { %395 = vst.msk [vmem:[%s1536_s11] sm:$0xf] %vm386_vm2, %v393_v14 }
 0x1b6   : > { %1012 = shalt.err (!%p1009_p9)
}
 0x1b7   : > { %s1013_s26 = scalar_lea.hbm %s1415_s18, 64  ;;  %s1017_s8 = scalar_lea.hbm %s1501_s6, 256 }
 0x1b8   : > { %p1014_p11 = scmp.ne.s32.totalorder %s1415_s18, %s1013_s26  ;;  %p1018_p13 = scmp.lt.s32.totalorder %s1415_s18, %s1501_s6 }
 0x1b9   : > { %p1019_p0 = scmp.lt.s32.totalorder %s1017_s8, %s1013_s26 }
 0x1ba   : > { %p1015_p10 = pnand %p1014_p11, %p1262_p3 }
 0x1bb   : > { %p1020_p1 = por %p1019_p0, %p1018_p13 }
 0x1bc   : > { %p1016_p12 = pneg %p1015_p10 }
 0x1be   : > { %p1021_p2 = pnand %p1020_p1, %p1016_p12 }
 0x1c0   : > { %1024 = shalt.err (!%p1021_p2)
}
 0x1c1   : > { %775 = dma.vmem_to_hbm [thread:$0]  (%p1262_p3), %s462_s0, 64, %s1415_s18, %s1390_s9  }
 0x1c2   : > { %s1537_s14 = sld [smem:[#allocation36_spill]]  ;;  %s1538_s7 = smov %s1535_s22 }
 0x1c3   : > { %s416_s28 = scalar_lea.sflag [#allocation14], %s1310_s23  ;;  %s1025_s22 = scalar_lea.vmem %s477_s21, 64 }
 0x1c4   : > { %p1026_p4 = scmp.ne.s32.totalorder %s477_s21, %s1025_s22  ;;  %s1163_s11 = smov [#allocation13]  }
 0x1c5   : > { %s1029_s16 = sshll.u32 %s1163_s11, 4  ;;  %s1030_s16 = int_to_ptr.vmem [resolvable:$false] %s1029_s16 }
 0x1c6   : > { %p1027_p5 = pnand %p1026_p4, %p1262_p3  ;;  %s1031_s9 = scalar_lea.vmem %s1030_s16, 128 }
 0x1c7   : > { %p1032_p7 = scmp.lt.s32.totalorder %s477_s21, %s1030_s16  ;;  %p1033_p9 = scmp.lt.s32.totalorder %s1031_s9, %s1025_s22 }
 0x1c8   : > { %s1443_s29 = scalar_lea.hbm %s1537_s14, %s1377_s27  ;;  %p1028_p6 = pneg %p1027_p5 }
 0x1c9   : > { %p1034_p11 = por %p1033_p9, %p1032_p7 }
 0x1cb   : > { %v397_v15 = vpop.permute.xlu0 %396  ;;  %p1035_p10 = pnand %p1034_p11, %p1028_p6 }
 0x1cc   : > { %399 = vst.msk [vmem:[%s1538_s7] sm:$0xf] %vm386_vm2, %v397_v15 }
 0x1cd   : > { %1038 = shalt.err (!%p1035_p10)
}
 0x1ce   : > { %s1039_s25 = scalar_lea.hbm %s1443_s29, 64  ;;  %s1043_s0 = scalar_lea.hbm %s1537_s14, 256 }
 0x1cf   : > { %p1040_p12 = scmp.ne.s32.totalorder %s1443_s29, %s1039_s25  ;;  %p1044_p1 = scmp.lt.s32.totalorder %s1443_s29, %s1537_s14 }
 0x1d0   : > { %p1045_p2 = scmp.lt.s32.totalorder %s1043_s0, %s1039_s25 }
 0x1d1   : > { %p1041_p13 = pnand %p1040_p12, %p1262_p3 }
 0x1d2   : > { %p1046_p4 = por %p1045_p2, %p1044_p1 }
 0x1d3   : > { %p1042_p0 = pneg %p1041_p13 }
 0x1d5   : > { %p1047_p5 = pnand %p1046_p4, %p1042_p0 }
 0x1d7   : > { %1050 = shalt.err (!%p1047_p5)
}
 0x1d8   : > { %776 = dma.vmem_to_hbm [thread:$0]  (%p1262_p3), %s477_s21, 64, %s1443_s29, %s416_s28  }
 0x1d9 PF: > { %s1539_s15 = sld [smem:[#allocation30_spill]] }
 0x1da   : > { %s1540_s19 = sld [smem:[#allocation25_spill]] }
 0x1df   : > { %p800_p6 = scmp.ge.s32.totalorder %s1539_s15, 2 }
 0x1e0   : > { %s488_s20 = sand.u32 1, %s1540_s19  }
 0x1e1   : > { %p786_p7 = pnand %p800_p6, %p1273_p8  ;;  %s489_s30 = scalar_lea.sflag [#allocation8], %s488_s20 }
 0x1e3   : > { %p787_p9 = pneg %p786_p7 }
 0x1e5   : > { %1100 = dma.done.wait (%p787_p9), %s489_s30, 128  }
 0x1e6   : > { %1102 = vsyncadd (%p787_p9), %s489_s30, 4294967168  ;;  %s1542_s8 = sadd.s32 4294967294, %s1539_s15  }
 0x1e7   : > { %s497_s12 = sand.u32 1, %s1542_s8  }
 0x1e8   : > { %s498_s24 = scalar_lea.sflag [#allocation11], %s497_s12 }
 0x1e9   : > { %1104 = dma.done.wait (%p787_p9), %s498_s24, 128  }
 0x1ea   : > { %1106 = vsyncadd (%p787_p9), %s498_s24, 4294967168  ;;  %s516_s17 = scalar_lea.sflag [#allocation14], %s488_s20 }
 0x1eb   : > { %1108 = dma.done.wait (%p787_p9), %s516_s17, 64  }
 0x1ec   : > { %1110 = vsyncadd (%p787_p9), %s516_s17, 4294967232  ;;  %s32_s10 = sadd.s32 1, %s1539_s15   ;;  %s1543_s27 = sld [smem:[#allocation26_spill]] }
 0x1ed   : > { %p29_p3 = scmp.ge.s32.totalorder %s32_s10, 6   ;;  %s1544_s28 = sld [smem:[#allocation27_spill]] }
 0x1ee   : > { %s1545_s29 = sld [smem:[#allocation34_spill]] }
 0x1ef   : > { %s1546_s30 = sld [smem:[#allocation28_spill]]  ;;  %31 = sbr.rel (!%p29_p3) target bundleno = 17 (0x11), region = 165 }
 0x1f0   : > { %s1547_s8 = sld [smem:[#allocation29_spill]] }
 0x1f1   : > { %s1548_s0 = sld [smem:[#allocation31_spill]] }
 0x1f2   : > { %s1549_s9 = sld [smem:[#allocation32_spill]] }
 0x1f4   :  { %521 = vsyncpa [#allocation7], 1 }
 0x1f5   :  { %523 = vsyncpa [#allocation7 + $0x1], 1 }
 0x1f6   :  { %524 = vsyncpa [#allocation8], 1 }
 0x1f7   :  { %526 = vsyncpa [#allocation8 + $0x1], 1 }
 0x1f8   :  { %527 = vsyncpa [#allocation11], 1 }
 0x1f9   :  { %529 = vsyncpa [#allocation11 + $0x1], 1 }
 0x1fa   :  { %530 = vsyncpa [#allocation14], 1 }
 0x1fb   :  { %532 = vsyncpa [#allocation14 + $0x1], 1 }
 0x1fc   :  { %533 = vsyncmov [#allocation3] }
 0x1ff   :  { %s534_s21 = vpop.sfrf %533 }
 0x200   :  { %p749_p8 = scmp.ne.s32.totalorder %s534_s21, 0 }
 0x202   :  { %538 = shalt.err (%p749_p8)  }
 0x203   :  { %540 = vsyncmov [#allocation3 + $0x1] }
 0x206   :  { %s541_s2 = vpop.sfrf %540 }
 0x207   :  { %p750_p11 = scmp.ne.s32.totalorder %s541_s2, 0 }
 0x209   :  { %545 = shalt.err (%p750_p11)  }
 0x20a   :  { %547 = vsyncmov [#allocation3 + $0x2] }
 0x20d   :  { %s548_s13 = vpop.sfrf %547 }
 0x20e   :  { %p751_p10 = scmp.ne.s32.totalorder %s548_s13, 0 }
 0x210   :  { %552 = shalt.err (%p751_p10)  }
 0x211   :  { %554 = vsyncmov [#allocation3 + $0x3] }
 0x214   :  { %s555_s1 = vpop.sfrf %554 }
 0x215   :  { %p752_p12 = scmp.ne.s32.totalorder %s555_s1, 0 }
 0x217   :  { %559 = shalt.err (%p752_p12)  }
 0x218   :  { %561 = vsyncmov [#allocation3 + $0x4] }
 0x21b   :  { %s562_s3 = vpop.sfrf %561 }
 0x21c   :  { %p753_p13 = scmp.ne.s32.totalorder %s562_s3, 0 }
 0x21e   :  { %566 = shalt.err (%p753_p13)  }
 0x21f   :  { %568 = vsyncmov [#allocation3 + $0x5] }
 0x222   :  { %s569_s4 = vpop.sfrf %568 }
 0x223   :  { %p754_p0 = scmp.ne.s32.totalorder %s569_s4, 0 }
 0x225   :  { %573 = shalt.err (%p754_p0)  }
 0x226   :  { %575 = vsyncmov [#allocation3 + $0x6] }
 0x229   :  { %s576_s5 = vpop.sfrf %575 }
 0x22a   :  { %p755_p1 = scmp.ne.s32.totalorder %s576_s5, 0 }
 0x22c   :  { %580 = shalt.err (%p755_p1)  }
 0x22d   :  { %582 = vsyncmov [#allocation3 + $0x7] }
 0x230   :  { %s583_s6 = vpop.sfrf %582 }
 0x231   :  { %p756_p2 = scmp.ne.s32.totalorder %s583_s6, 0 }
 0x233   :  { %587 = shalt.err (%p756_p2)  }

</bundles_post_ra>
